<compile_context>
chip_gen: v6e
topology: v6e:2x2x1
jax: 0.10.0
libtpu: 0.0.40
codegen_flags: <defaults>
</compile_context>

<pallas_src>
import functools

import jax
import jax.numpy as jnp
from jax.experimental import pallas as pl
from jax.experimental.pallas import tpu as pltpu


_MAX_TILE_ELEMS = 256 * 1024   # 1 MiB f32 per block; x/P/out double-buffered
                               # ~ 6 MiB scoped VMEM -> fits v5e/v6e/v7x defaults.


def _choose_tile(l_total, max_elems=_MAX_TILE_ELEMS):
    """Largest lane-dense (multiple-of-128) divisor of l_total that is <= max_elems."""
    if l_total % 128 != 0:
        # TODO(synk): non-128-aligned S*H falls back to one full (masked) row per block.
        return l_total
    if l_total <= max_elems:
        return l_total
    t = max_elems - (max_elems % 128)
    while t >= 128:
        if l_total % t == 0:
            return t
        t -= 128
    return 128


def _pe_dropout_kernel(seed_ref, x_ref, p_ref, o_ref, *,
                       keep_thr, inv_keep, l_total, tile):
    """One grid step: one (1, 1, tile) lane-dense slab of one batch row."""
    y = x_ref[...].astype(jnp.float32) + p_ref[...].astype(jnp.float32)

    if keep_thr is not None:
        # Inverted dropout with a stateless hash PRNG (all VPU ops; mem-bound
        # kernel has plenty of VALU slack).  Pure uint32 math: full 32 bits of
        # entropy, no signed/unsigned promotion or int32 overflow pitfalls.
        t = pl.program_id(0)
        b = pl.program_id(1)
        lane = jax.lax.broadcasted_iota(jnp.int32, y.shape, dimension=2)
        idx = b * l_total + t * tile + lane                    # global element index
        z = idx.astype(jnp.uint32) * jnp.uint32(0x9E3779B9)
        z = z + seed_ref[0].astype(jnp.uint32)
        z = (z ^ (z >> 16)) * jnp.uint32(0x85EBCA6B)           # murmur3 finalizer
        z = (z ^ (z >> 13)) * jnp.uint32(0xC2B2AE35)
        bits = z ^ (z >> 16)
        keep = bits < jnp.uint32(keep_thr)                     # uint32 compare
        y = jnp.where(keep, y * jnp.float32(inv_keep), jnp.float32(0.0))

    o_ref[...] = y.astype(o_ref.dtype)


def make_positional_table(num_hiddens, max_len=1000):
    """Plain-JAX construction of the sinusoidal table (matches torch init)."""
    pos = jnp.arange(max_len, dtype=jnp.float32).reshape(-1, 1)
    div = jnp.power(
        10000.0, jnp.arange(0, num_hiddens, 2, dtype=jnp.float32) / num_hiddens
    )
    angles = pos / div                                   # (max_len, num_hiddens/2)
    P = jnp.zeros((1, max_len, num_hiddens), jnp.float32)
    P = P.at[:, :, 0::2].set(jnp.sin(angles))
    P = P.at[:, :, 1::2].set(jnp.cos(angles))
    return P


def positional_encoding_forward(x, P, *, dropout_p, seed=0, training=True):
    """x: (B, S, H).  P: (1, max_len, H) float32."""
    B, S, H = x.shape
    L = S * H
    P_slice = P[:, :S, :]

    # Lane-dense presentation: (B, 1, L) / (1, 1, L).
    x2 = x.reshape(B, 1, L)
    p2 = P_slice.reshape(1, 1, L).astype(jnp.float32)

    tile = _choose_tile(L)
    n_tiles = L // tile

    keep_prob = 1.0 if (not training or dropout_p == 0.0) else 1.0 - dropout_p
    if keep_prob < 1.0:
        keep_thr = min(int(round(keep_prob * 4294967296.0)), 4294967295)
        inv_keep = 1.0 / keep_prob
    else:
        keep_thr = None
        inv_keep = 1.0

    seed_arr = jnp.array([seed], dtype=jnp.int32)
    kernel = functools.partial(_pe_dropout_kernel, keep_thr=keep_thr,
                               inv_keep=inv_keep, l_total=L, tile=tile)

    out2 = pl.pallas_call(
        kernel,
        out_shape=jax.ShapeDtypeStruct((B, 1, L), x.dtype),
        grid_spec=pltpu.PrefetchScalarGridSpec(
            num_scalar_prefetch=1,                        # seed lands in SMEM
            grid=(n_tiles, B),                            # tile OUTER, batch INNER
            in_specs=[
                pl.BlockSpec((1, 1, tile), lambda t, b, seed: (b, 0, t)),  # X slab
                pl.BlockSpec((1, 1, tile), lambda t, b, seed: (0, 0, t)),  # P (reused across B)
            ],
            out_specs=pl.BlockSpec((1, 1, tile), lambda t, b, seed: (b, 0, t)),
        ),
        compiler_params=pltpu.CompilerParams(
            # Blocks are fully order-independent (stateless PRNG), so both axes
            # are parallel -> v7x can shard the grid across its 2 TensorCores.
            dimension_semantics=("parallel", "parallel"),
        ),
    )(seed_arr, x2, p2)

    return out2.reshape(B, S, H)


if __name__ == "__main__":
    num_hiddens = 32
    max_len = 1000
    dropout_p = 0.1
    B, S = 2, 8

    key = jax.random.PRNGKey(0)
    x = jax.random.normal(key, (B, S, num_hiddens), dtype=jnp.float32)
    P = make_positional_table(num_hiddens, max_len)
    ref = x + P[:, :S, :]

    # Eval mode (dropout disabled): must match the plain add exactly.
    out_eval = positional_encoding_forward(x, P, dropout_p=dropout_p, training=False)
    out_eval = jax.block_until_ready(out_eval)
    assert out_eval.shape == (B, S, num_hiddens)
    assert out_eval.dtype == x.dtype
    assert jnp.allclose(out_eval, ref, atol=1e-6, rtol=1e-6)

    # Training mode: every element is either 0 (dropped) or (x+P)/keep_prob (kept).
    out_train = positional_encoding_forward(x, P, dropout_p=dropout_p, seed=123,
                                            training=True)
    out_train = jax.block_until_ready(out_train)
    assert out_train.shape == (B, S, num_hiddens)
    assert out_train.dtype == x.dtype
    scaled = ref / (1.0 - dropout_p)
    ok = jnp.isclose(out_train, scaled, atol=1e-5) | (out_train == 0.0)
    assert bool(jnp.all(ok))

    print("KERNEL_OK")
</pallas_src>

<mosaic_0001>
module attributes {stable_mosaic.version = 11 : i64} {
  func.func @_pe_dropout_kernel(%arg0: i32, %arg1: i32, %arg2: memref<1xi32, #tpu.memory_space<smem>>, %arg3: memref<1x1x256xf32, #tpu.memory_space<vmem>>, %arg4: memref<1x1x256xf32, #tpu.memory_space<vmem>>, %arg5: memref<1x1x256xf32, #tpu.memory_space<vmem>>) attributes {dimension_semantics = [#tpu.dimension_semantics<parallel>, #tpu.dimension_semantics<parallel>], iteration_bounds = array<i64: 1, 2>, scalar_prefetch = 1 : i64, scratch_operands = 0 : i64, tpu.core_type = #tpu.core_type<tc>, window_params = [{transform_indices = @transform_0, window_bounds = array<i64: 1, 1, 256>}, {transform_indices = @transform_1, window_bounds = array<i64: 1, 1, 256>}, {transform_indices = @transform_2, window_bounds = array<i64: 1, 1, 256>}]} {
    %c0 = arith.constant 0 : index
    %c0_0 = arith.constant 0 : index
    %c0_1 = arith.constant 0 : index
    %0 = vector.load %arg3[%c0, %c0_0, %c0_1] : memref<1x1x256xf32, #tpu.memory_space<vmem>>, vector<1x1x256xf32>
    %c0_2 = arith.constant 0 : index
    %c0_3 = arith.constant 0 : index
    %c0_4 = arith.constant 0 : index
    %1 = vector.load %arg4[%c0_2, %c0_3, %c0_4] : memref<1x1x256xf32, #tpu.memory_space<vmem>>, vector<1x1x256xf32>
    %2 = arith.addf %0, %1 : vector<1x1x256xf32>
    %c0_5 = arith.constant 0 : index
    %c0_6 = arith.constant 0 : index
    %c0_7 = arith.constant 0 : index
    %3 = vector.load %arg5[%c0_5, %c0_6, %c0_7] : memref<1x1x256xf32, #tpu.memory_space<vmem>>, vector<1x1x256xf32>
    tpu.vector_store %arg5[%c0_5, %c0_6, %c0_7], %2 {strides = array<i32>} : memref<1x1x256xf32, #tpu.memory_space<vmem>>, vector<1x1x256xf32>,
    return
  }
  func.func @transform_0(%arg0: i32, %arg1: i32, %arg2: memref<1xi32, #tpu.memory_space<smem>>) -> (i32, i32, i32) {
    %c0_i32 = arith.constant 0 : i32
    %c0_i32_0 = arith.constant 0 : i32
    return %arg1, %c0_i32, %arg0 : i32, i32, i32
  }
  func.func @transform_1(%arg0: i32, %arg1: i32, %arg2: memref<1xi32, #tpu.memory_space<smem>>) -> (i32, i32, i32) {
    %c0_i32 = arith.constant 0 : i32
    %c0_i32_0 = arith.constant 0 : i32
    %c0_i32_1 = arith.constant 0 : i32
    return %c0_i32, %c0_i32_0, %arg0 : i32, i32, i32
  }
  func.func @transform_2(%arg0: i32, %arg1: i32, %arg2: memref<1xi32, #tpu.memory_space<smem>>) -> (i32, i32, i32) {
    %c0_i32 = arith.constant 0 : i32
    %c0_i32_0 = arith.constant 0 : i32
    return %arg1, %c0_i32, %arg0 : i32, i32, i32
  }
}

</mosaic_0001>

<bundles_post_ra>
// kernel: tpu_custom_call.1
= control target key start
LH: loop header
LB: loop body
LE: loop exit
PB: predicated region body
PF: predicated region fallthrough
CT: control target
= control target key end

     0   :  { %9 = vsyncpa [#allocation5], 0  ;;  %s671_s0 = inlined_call_operand.<no memory space> [shape: s32[1], index: 0, kind: input, shape index: {}]   ;;  %s672_s1 = inlined_call_operand.hbm [shape: f32[2,1,256], index: 1, kind: input, shape index: {}]   ;;  %s673_s2 = inlined_call_operand.vmem [shape: f32[1,1,256], index: 2, kind: input, shape index: {}]   ;;  %s674_s3 = inlined_call_operand.hbm [shape: f32[2,1,256], index: 3, kind: output, shape index: {}]  }
   0x1   :  { %11 = vsyncpa [#allocation5 + $0x1], 0 }
   0x2   :  { %12 = vsyncpa [#allocation6], 0 }
   0x3   :  { %14 = vsyncpa [#allocation6 + $0x1], 0  ;;  %s534_s12 = smov 0   ;;  %s536_s13 = smov 0  }
   0x4   :  { %s538_s14 = smov 0   ;;  %s540_s0 = smov 0  }
   0x5   :  { %s542_s15 = smov 0   ;;  %s544_s16 = smov 0  }
   0x6 LB: > { %s322_s17 = sadd.s32 4294967295, %s510_s16   ;;  %s323_s18 = sadd.s32 4294967294, %s510_s16   ;;  %s510_s16 = sphi %s544_s16, %s20_s16   ;;  %s506_s15 = sphi %s542_s15, %s686_s15   ;;  %s502_s0 = sphi %s540_s0, %s685_s0   ;;  %s498_s14 = sphi %s538_s14, %s684_s14   ;;  %s494_s13 = sphi %s536_s13, %s683_s13   ;;  %s490_s12 = sphi %s534_s12, %s682_s12  }
   0x7   : > { %s29_s19 = sadd.s32 1, %s506_s15  ;;  %s41_s20 = sadd.s32 1, %s498_s14 }
   0x8   : > { %p30_p0 = scmp.ge.s32.totalorder %s29_s19, 2  ;;  %p48_p1 = scmp.ne.s32.totalorder %s498_s14, %s494_s13 }
   0x9   : > { %p49_p2 = scmp.eq.s32.totalorder %s510_s16, 0  ;;  %p54_p3 = scmp.ne.s32.totalorder %s494_s13, %s490_s12 }
   0xa   : > { %s688_s19 = smov (%p30_p0, %s29_s19), 0  ;;  %p55_p5 = scmp.eq.s32.totalorder %s322_s17, 0 }
   0xb   : > { %p575_p4 = por %p49_p2, %p48_p1  ;;  %s36_s22 = ssub.s32 %s506_s15, %s688_s19 }
   0xc   : > { %p106_p6 = scmp.eq.s32.totalorder %s322_s17, 1  ;;  %p39_p7 = scmp.eq.s32.totalorder %s36_s22, 0 }
   0xd   : > { %p581_p8 = por %p55_p5, %p54_p3  ;;  %p112_p10 = scmp.eq.s32.totalorder %s323_s18, 1 }
   0xe   : > { %p585_p9 = por %p106_p6, %p48_p1  ;;  %p352_p13 = scmp.lt.s32.totalorder %s510_s16, 2 }
   0xf   : > { %s590_s25 = scalar_select %p39_p7, %s498_s14, %s41_s20  }
  0x10   : > { %p592_p11 = por %p112_p10, %p54_p3  ;;  %s140_s27 = sand.u32 1, %s498_s14  }
  0x11   : > { %s327_s28 = sshll.u32 %s140_s27, 1  ;;  %s338_s29 = sshll.u32 %s506_s15, 5 }
  0x12   : > { %s678_s26 = scalar_select %p592_p11, 1, 0 }
  0x13   : > { %s152_s5 = scalar_lea.hbm %s672_s1, %s338_s29  ;;  %s144_s6 = scalar_lea.vmem [#allocation4], %s327_s28 }
  0x14   : > { %s154_s7 = sshll.u32 %s144_s6, 4  ;;  %p605_p0 = pnand %p352_p13, %p575_p4  ;;  %s155_s7 = int_to_ptr.vmem [resolvable:$true] %s154_s7 }
  0x15   : > { %p330_p1 = scmp.ge.s32.totalorder %s510_s16, 1  ;;  %p159_p2 = scmp.lt.s32.totalorder %s510_s16, 3 }
  0x16   : > { %s141_s9 = scalar_lea.sflag [#allocation5], %s140_s27  ;;  %p404_p3 = pneg %p605_p0 }
  0x17   : > { %s415_s10 = scalar_lea.vmem %s155_s7, 32  ;;  %s512_s11 = smov [#allocation4]  }
  0x18   : > { %p416_p5 = scmp.ne.s32.totalorder %s155_s7, %s415_s10  ;;  %s420_s17 = sshll.u32 %s512_s11, 4  ;;  %s421_s17 = int_to_ptr.vmem [resolvable:$false] %s420_s17 }
  0x19   : > { %s422_s18 = scalar_lea.vmem %s421_s17, 64  ;;  %p423_p10 = scmp.lt.s32.totalorder %s155_s7, %s421_s17 }
  0x1a   : > { %p418_p6 = pnand %p416_p5, %p404_p3  ;;  %p424_p12 = scmp.lt.s32.totalorder %s422_s18, %s415_s10 }
  0x1c   : > { %p419_p7 = pneg %p418_p6  ;;  %p425_p4 = por %p424_p12, %p423_p10 }
  0x1e   : > { %p426_p13 = pnand %p425_p4, %p419_p7 }
  0x20   : > { %429 = shalt.err (!%p426_p13)
}
  0x21   : > { %347 = dma.hbm_to_vmem [thread:$0]  (!%p605_p0), %s152_s5, 32, %s155_s7, %s141_s9  }
  0x22   : > { %p160_p11 = pnand %p330_p1, %p159_p2 }
  0x23   : > { %s620_s20 = sand.u32 (!%p160_p11), 1, %s494_s13  }
  0x24   : > { %163 = sbr.rel (%p160_p11) target bundleno = 66 (0x42), region = 28  ;;  %s331_s21 = sshll.u32 (!%p160_p11), %s620_s20, 1 }
  0x25   : > { %s166_s22 = scalar_lea.sflag (!%p160_p11), [#allocation5], %s620_s20  ;;  %s169_s27 = scalar_lea.vmem (!%p160_p11), [#allocation4], %s331_s21 }
  0x29   : > { %481 = dma.done.wait (%p581_p8), %s166_s22, 32  }
  0x2a   : > { %483 = vsyncadd (%p581_p8), %s166_s22, 4294967264  ;;  %v204_v0 = vlaneseq  ;;  %s193_s28 = scalar_lea.vmem [#allocation7], %s331_s21  ;;  %s339_s30 = sshll.u32 %s502_s0, 5  ;;  %v201_v1 = vld [vmem:[%s169_s27] sm:$0x3] }
  0x2b   : > { %s226_s29 = sshll.u32 %s193_s28, 4  ;;  %v202_v2 = vld [vmem:[%s673_s2] sm:$0x3]  ;;  %s224_s23 = scalar_lea.hbm %s674_s3, %s339_s30  ;;  %s227_s29 = int_to_ptr.vmem [resolvable:$true] %s226_s29 }
  0x2c   : > { %vm206_vm0 = vcmp.lt.s32.totalorder %v204_v0, 256  ;;  %v203_v3 = vadd.f32 %v202_v2, %v201_v1  ;;  %s210_s8 = scalar_lea.sflag [#allocation6], %s620_s20  ;;  %s430_s9 = scalar_lea.vmem %s227_s29, 32 }
  0x2d   : > { %p431_p8 = scmp.ne.s32.totalorder %s227_s29, %s430_s9  ;;  %s513_s0 = smov [#allocation7]  }
  0x2e   : > { %208 = vst.msk [vmem:[%s193_s28] sm:$0x3] %vm206_vm0, %v203_v3  ;;  %s434_s10 = sshll.u32 %s513_s0, 4  ;;  %s435_s10 = int_to_ptr.vmem [resolvable:$false] %s434_s10 }
  0x2f   : > { %p432_p11 = pnand %p431_p8, %p585_p9  ;;  %s436_s11 = scalar_lea.vmem %s435_s10, 64 }
  0x30   : > { %p437_p0 = scmp.lt.s32.totalorder %s227_s29, %s435_s10  ;;  %p438_p1 = scmp.lt.s32.totalorder %s436_s11, %s430_s9 }
  0x31   : > { %p433_p12 = pneg %p432_p11 }
  0x32   : > { %p439_p2 = por %p438_p1, %p437_p0 }
  0x34   : > { %p440_p3 = pnand %p439_p2, %p433_p12 }
  0x36   : > { %443 = shalt.err (!%p440_p3)
}
  0x37   : > { %s444_s17 = scalar_lea.hbm %s224_s23, 32  ;;  %s448_s21 = scalar_lea.hbm %s674_s3, 64 }
  0x38   : > { %p445_p5 = scmp.ne.s32.totalorder %s224_s23, %s444_s17  ;;  %p449_p10 = scmp.lt.s32.totalorder %s224_s23, %s674_s3 }
  0x39   : > { %p450_p4 = scmp.lt.s32.totalorder %s448_s21, %s444_s17 }
  0x3a   : > { %p446_p6 = pnand %p445_p5, %p585_p9 }
  0x3b   : > { %p451_p13 = por %p450_p4, %p449_p10 }
  0x3c   : > { %p447_p7 = pneg %p446_p6 }
  0x3e   : > { %p452_p8 = pnand %p451_p13, %p447_p7 }
  0x40   : > { %455 = shalt.err (!%p452_p8)
}
  0x41   : > { %342 = dma.vmem_to_hbm [thread:$0]  (%p585_p9), %s227_s29, 32, %s224_s23, %s210_s8  }
  0x42 PF: > { %s238_s28 = sand.u32 1, %s490_s12   ;;  %p680_p11 = scmp.ne.s32.totalorder %s678_s26, 0 }
  0x43   : > { %p681_p12 = scmp.ge.s32.totalorder %s510_s16, 2  ;;  %s239_s30 = scalar_lea.sflag [#allocation6], %s238_s28 }
  0x45   : > { %p349_p0 = pnand %p681_p12, %p680_p11 }
  0x47   : > { %p350_p1 = pneg %p349_p0 }
  0x49   : > { %485 = dma.done.wait (%p350_p1), %s239_s30, 32  }
  0x4a   : > { %487 = vsyncadd (%p350_p1), %s239_s30, 4294967264  ;;  %s20_s16 = sadd.s32 1, %s510_s16   ;;  %s682_s12 = smov %s494_s13 }
  0x4b   : > { %p17_p2 = scmp.ge.s32.totalorder %s20_s16, 4   ;;  %s683_s13 = smov %s498_s14 }
  0x4c   : > { %s684_s14 = smov %s590_s25  ;;  %s685_s0 = smov %s506_s15 }
  0x4d   : > { %s686_s15 = smov %s688_s19  ;;  %19 = sbr.rel (!%p17_p2) target bundleno = 6 (0x6), region = 76 }
  0x52   :  { %244 = vsyncpa [#allocation5], 1 }
  0x53   :  { %246 = vsyncpa [#allocation5 + $0x1], 1 }
  0x54   :  { %247 = vsyncpa [#allocation6], 1 }
  0x55   :  { %249 = vsyncpa [#allocation6 + $0x1], 1 }

</bundles_post_ra>
